<compile_context>
chip_gen: v6e
topology: v6e:2x2x1
jax: 0.10.0
libtpu: 0.0.40
codegen_flags: <defaults>
</compile_context>

<pallas_src>
import math

import jax
import jax.numpy as jnp
from jax import lax
from jax.experimental import pallas as pl
from jax.experimental.pallas import tpu as pltpu


# ----------------------------------------------------------------------------
# Host-side precomputation (runs once, outside the kernel)
# ----------------------------------------------------------------------------
def conv_to_banded(w, W):
    """w: (Cout, Cin, 3, 3) PyTorch-layout conv weight -> (3, W*Cin, W*Cout).

    B_kh[wi*Cin + ci, wo*Cout + co] = w[co, ci, kh, wi - wo + 1] if |wi-wo|<=1
    else 0, so X(rows, W*Cin) @ B_kh realizes the kw sweep (incl. the
    w-boundary zero padding) of tap row kh as one dense matmul."""
    taps = jnp.transpose(w, (2, 3, 1, 0))                  # (kh, kw, Cin, Cout)
    wi = jnp.arange(W)[:, None]                            # input column
    wo = jnp.arange(W)[None, :]                            # output column
    kw = wi - wo + 1                                       # tap index
    valid = ((kw >= 0) & (kw <= 2)).astype(w.dtype)
    kw_c = jnp.clip(kw, 0, 2)
    B = taps[:, kw_c]                                      # (3, W, W, Cin, Cout)
    B = B * valid[None, :, :, None, None]
    B = jnp.transpose(B, (0, 1, 3, 2, 4))                  # (3, wi, ci, wo, co)
    Cin, Cout = w.shape[1], w.shape[0]
    return B.reshape(3, W * Cin, W * Cout)


def conv_transpose_as_conv(w):
    """F.conv_transpose2d(y, w, padding=1, stride=1) == conv3x3_same(y, w')
    with w'[o, i, kh, kw] = w[i, o, 2-kh, 2-kw].
    NOTE: only valid for stride=1, padding=1 (true for this module)."""
    return jnp.transpose(w, (1, 0, 2, 3))[:, :, ::-1, ::-1]


def detect_roll_convention():
    """Return True iff pltpu.roll matches jnp.roll (out[r] = in[r - shift]).

    Tiny one-time probe kernel; the main kernel's row/lane shifts are built
    from this flag so the forward is robust to the roll sign convention."""
    x = jnp.arange(8 * 128, dtype=jnp.float32).reshape(8, 128)

    def k(x_ref, o_ref):
        o_ref[...] = pltpu.roll(x_ref[...], 1, axis=0)

    y = pl.pallas_call(
        k, out_shape=jax.ShapeDtypeStruct((8, 128), jnp.float32))(x)
    return bool(jnp.allclose(y[1], x[0]))


def prepare_network(params, metas, S, B_img):
    """Turn raw parameters into kernel-ready (lane-dense, bf16) operands."""
    f32, bf16 = jnp.float32, jnp.bfloat16
    scal_parts, blk_args = [], []
    for bp, m in zip(params["blocks"], metas):
        H, W, nf, nl = m["H"], m["W"], m["nf"], m["nl"]
        resc = bp["rescalings"].astype(f32)
        # TODO(synk): Positive() is not defined in the source module; using a
        # clamp-to-nonnegative map (ReLU) as the positivity transform on u.
        dts = (jnp.maximum(bp["u"], 0.0) / float(S)).astype(f32)
        scal_parts += [resc[-1:], jnp.clip(resc[:-1], 0.0, 1.0), dts]

        w1 = conv_to_banded(bp["w1"], W).astype(bf16)
        wc = jnp.stack([conv_to_banded(bp["conv_w"][i], W)
                        for i in range(nl)]).astype(bf16)
        wct = jnp.stack(
            [conv_to_banded(conv_transpose_as_conv(bp["conv_w"][i + 1]), W)
             for i in range(0, nl, 2)]).astype(bf16)
        bias = jnp.stack([jnp.tile(bp["conv_b"][i], W)[None, :]
                          for i in range(nl)]).astype(f32)

        # even-column (w) selection for the pool: (W*nf, (W//2)*nf)
        li = jnp.arange(W * nf)
        lo = jnp.arange((W // 2) * nf)
        ce = (((li[:, None] // nf) == 2 * (lo[None, :] // nf))
              & ((li[:, None] % nf) == (lo[None, :] % nf))).astype(bf16)
        # even-row selection for the pool: (B_img*H//2, B_img*H)
        R = B_img * H
        rsel = (jnp.arange(R)[None, :] ==
                2 * jnp.arange(R // 2)[:, None]).astype(bf16)
        blk_args += [w1, wc, wct, bias, ce, rsel]

    # FC: flatten follows the NCHW ordering; permute fc_w rows into the
    # kernel's lane-dense (h, w*C + c) order so no transpose is needed.
    H3, W3, C3 = metas[-1]["H"] // 2, metas[-1]["W"] // 2, metas[-1]["nf"]
    h = jnp.arange(H3)[:, None, None]
    w = jnp.arange(W3)[None, :, None]
    c = jnp.arange(C3)[None, None, :]
    flat_idx = (c * (H3 * W3) + h * W3 + w).reshape(H3, W3 * C3)
    fc_wp = params["fc_w"][flat_idx].astype(bf16)          # (H3, W3*C3, 10)
    col = jnp.arange(B_img * H3)[None, None, :]
    bb = jnp.arange(B_img)[None, :, None]
    hh = jnp.arange(H3)[:, None, None]
    fc_sel = (col == bb * H3 + hh).astype(bf16)            # (H3, B_img, B_img*H3)
    fc_b = params["fc_b"].reshape(1, 10).astype(f32)

    return dict(scal=jnp.concatenate(scal_parts).astype(f32),
                blk_args=blk_args, fc_wp=fc_wp, fc_sel=fc_sel, fc_b=fc_b)


# ----------------------------------------------------------------------------
# One fused Pallas kernel for the whole network forward
# ----------------------------------------------------------------------------
def make_fused_kernel(metas, S, a, B_img, roll_matches_jnp):
    f32, bf16 = jnp.float32, jnp.bfloat16
    nb = len(metas)

    def kernel(scal_ref, x_ref, *refs):
        per = 6
        blk = [refs[per * i: per * (i + 1)] for i in range(nb)]
        fc_wp_ref, fc_sel_ref, fc_b_ref, out_ref = refs[per * nb:]

        def dotf(av, bv):
            # bf16 operands, explicit f32 accumulation (MXU-native everywhere).
            return jnp.dot(av.astype(bf16), bv.astype(bf16),
                           preferred_element_type=f32)

        def lrelu(z):
            return jnp.where(z >= 0, z, a * z)

        def shift_rows(v, delta):
            # out[r, :] = v[r + delta, :]  (cyclic; caller masks wrapped rows)
            R = v.shape[0]
            s = (-delta) % R if roll_matches_jnp else delta % R
            return pltpu.roll(v, s, axis=0)

        def shift_lanes(v, delta):
            L = v.shape[1]
            s = (-delta) % L if roll_matches_jnp else delta % L
            return pltpu.roll(v, s, axis=1)

        x = x_ref[0]                                       # (B_img*H, W*Cin) f32

        off = 0
        for bi, m in enumerate(metas):
            H, W, nf, nl = m["H"], m["W"], m["nf"], m["nl"]
            R = B_img * H
            w1_ref, wc_ref, wct_ref, bias_ref, ce_ref, rsel_ref = blk[bi]

            # Per-image top/bottom boundary masks (zero rows that wrapped
            # across an image boundary after a sublane roll).  Hoisted once
            # per block and reused by every conv in the block.
            row = lax.broadcasted_iota(jnp.int32, (R, 1), 0)
            keep_top = ((row % H) != 0).astype(f32)        # invalid for delta=-1
            keep_bot = ((row % H) != (H - 1)).astype(f32)  # invalid for delta=+1

            def conv3x3(xv, taps, keep_top=keep_top, keep_bot=keep_bot):
                # 3x3 "same" conv:  out = sum_kh shift_rows(x, kh-1) @ B_kh
                x_up = shift_rows(xv, -1) * keep_top       # row ho-1 (kh=0)
                x_dn = shift_rows(xv, +1) * keep_bot       # row ho+1 (kh=2)
                return (dotf(x_up, taps(0)) + dotf(xv, taps(1))
                        + dotf(x_dn, taps(2)))

            # x = relu(rescalings[-1] * conv1(x))   (conv1 has no bias)
            z = conv3x3(x, lambda kh: w1_ref[kh])
            x = jnp.maximum(scal_ref[off] * z, 0.0)

            nresc = nl // 2
            for i in range(0, nl, 2):
                resc_i = scal_ref[off + 1 + i // 2]
                dte = scal_ref[off + 1 + nresc + i]
                dtc = scal_ref[off + 1 + nresc + i + 1]
                # TODO(synk): for large nl/S convert these static loops to
                # lax.fori_loop(..., unroll=True) to bound vreg live ranges.
                for _ in range(S):
                    # x = x + dte * resc * leaky_relu(Ae(x) + be)
                    ze = conv3x3(x, lambda kh, i=i: wc_ref[i, kh]) + bias_ref[i]
                    x = x + (dte * resc_i) * lrelu(ze)
                    # x = x - dtc * conv_transpose2d(leaky_relu(Ac(x)+bc), Ac.w)
                    zc = (conv3x3(x, lambda kh, i=i: wc_ref[i + 1, kh])
                          + bias_ref[i + 1])
                    zt = conv3x3(lrelu(zc), lambda kh, i=i: wct_ref[i // 2, kh])
                    x = x - dtc * zt
            off += 1 + nresc + nl

            # fused 2x2 / stride-2 maxpool:
            #   columns: pair-max via lane roll + one even-w selection matmul
            #   rows:    pair-max via sublane roll + one even-row selection matmul
            C = nf
            cm = jnp.maximum(x, shift_lanes(x, C))
            t = dotf(cm, ce_ref[...])                      # (R, (W//2)*C)
            rm = jnp.maximum(t, shift_rows(t, +1))
            x = dotf(rsel_ref[...], rm)                    # (B_img*H//2, (W//2)*C)

        # fused Flatten (NCHW order) + Linear via pre-permuted weights:
        #   out[b] = sum_h x[b*H3 + h, :] @ Wp[h]  + fc_b
        H3 = metas[-1]["H"] // 2
        acc = jnp.zeros((B_img, 10), f32)
        for h in range(H3):
            xh = dotf(fc_sel_ref[h], x)                    # (B_img, W3*C3)
            acc = acc + dotf(xh, fc_wp_ref[h])             # (B_img, 10)
        out_ref[0] = acc + fc_b_ref[...]

    return kernel


def network_forward_pallas(x_nchw, prep, metas, S, a, B_img, roll_matches_jnp):
    N, Cin, H, W = x_nchw.shape
    assert N % B_img == 0
    G = N // B_img
    # NCHW -> lane-dense (rows, W*Cin) with lane index w*Cin + c, grouped so
    # each grid step processes B_img images stacked along the sublane axis.
    x = jnp.transpose(x_nchw.astype(jnp.float32), (0, 2, 3, 1))
    x = x.reshape(G, B_img * H, W * Cin)

    def cmap(nd):
        return lambda n: (0,) * nd

    in_specs = [pl.BlockSpec(memory_space=pltpu.MemorySpace.SMEM),   # scalars
                pl.BlockSpec((1, B_img * H, W * Cin), lambda n: (n, 0, 0))]
    args = [prep["scal"], x]
    for arr in prep["blk_args"]:
        in_specs.append(pl.BlockSpec(arr.shape, cmap(arr.ndim)))
        args.append(arr)
    for arr in (prep["fc_wp"], prep["fc_sel"], prep["fc_b"]):
        in_specs.append(pl.BlockSpec(arr.shape, cmap(arr.ndim)))
        args.append(arr)

    out = pl.pallas_call(
        make_fused_kernel(metas, S, a, B_img, roll_matches_jnp),
        out_shape=jax.ShapeDtypeStruct((G, B_img, 10), jnp.float32),
        grid=(G,),
        in_specs=in_specs,
        out_specs=pl.BlockSpec((1, B_img, 10), lambda n: (n, 0, 0)),
        compiler_params=pltpu.CompilerParams(
            dimension_semantics=("parallel",)),            # v7x: 2 TCs share G
    )(*args)
    return out.reshape(N, 10)


# ----------------------------------------------------------------------------
# Parameter init (mirrors the PyTorch module defaults)
# ----------------------------------------------------------------------------
def _delta_orthogonal(key, nf, gain):
    m = jax.random.normal(key, (nf, nf), jnp.float32)
    q, r = jnp.linalg.qr(m)
    q = q * jnp.sign(jnp.diagonal(r))[None, :]
    w = jnp.zeros((nf, nf, 3, 3), jnp.float32)
    return w.at[:, :, 1, 1].set(gain * q)                  # (Cout, Cin, 3, 3)


def init_cnn_block(key, in_chan, nf, n_layers, a):
    keys = jax.random.split(key, 3 + 2 * n_layers)
    gain = math.sqrt(2.0 / (1.0 + a * a))                  # calculate_gain('leaky_relu', a)
    b1 = 1.0 / math.sqrt(in_chan * 9)
    w1 = jax.random.uniform(keys[0], (nf, in_chan, 3, 3), jnp.float32, -b1, b1)
    u = jax.random.uniform(keys[1], (n_layers,), jnp.float32)
    rescalings = jax.random.uniform(keys[2], (1 + n_layers // 2,), jnp.float32)
    conv_w, conv_b = [], []
    bb = 1.0 / math.sqrt(nf * 9)
    for i in range(n_layers):
        conv_w.append(_delta_orthogonal(keys[3 + 2 * i], nf, gain))
        conv_b.append(jax.random.uniform(keys[4 + 2 * i], (nf,), jnp.float32, -bb, bb))
    return dict(w1=w1, u=u, rescalings=rescalings, conv_w=conv_w, conv_b=conv_b)


def init_network(key, in_chan, nfs, nls, a):
    k1, k2, k3, kfc = jax.random.split(key, 4)
    chans = [in_chan, nfs[0], nfs[1]]
    blocks = [init_cnn_block(k, c, nf, nl, a)
              for k, c, nf, nl in zip((k1, k2, k3), chans, nfs, nls)]
    kk3 = 32 // (2 ** 2)                                   # block-3 kk = 8
    last = int((kk3 / 2) ** 2 * nfs[2])                    # = 16 * nf3
    kw, kb = jax.random.split(kfc)
    bound = 1.0 / math.sqrt(last)
    fc_w = jax.random.uniform(kw, (last, 10), jnp.float32, -bound, bound)
    fc_b = jax.random.uniform(kb, (10,), jnp.float32, -bound, bound)
    return dict(blocks=blocks, fc_w=fc_w, fc_b=fc_b)


# ----------------------------------------------------------------------------
# Pure-JAX reference (NCHW, lax.conv, HIGHEST precision) for correctness check
# ----------------------------------------------------------------------------
def reference_forward(x_nchw, params, a, S):
    hp = lax.Precision.HIGHEST

    def conv(h, w, b=None):
        o = lax.conv_general_dilated(
            h, w, (1, 1), ((1, 1), (1, 1)),
            dimension_numbers=("NCHW", "OIHW", "NCHW"), precision=hp)
        if b is not None:
            o = o + b[None, :, None, None]
        return o

    def lrelu(v):
        return jnp.where(v >= 0, v, a * v)

    x = x_nchw.astype(jnp.float32)
    for bp in params["blocks"]:
        resc = bp["rescalings"]
        resc_c = jnp.clip(resc[:-1], 0.0, 1.0)
        x = jnp.maximum(resc[-1] * conv(x, bp["w1"]), 0.0)
        dts = jnp.maximum(bp["u"], 0.0) / float(S)
        nl = bp["u"].shape[0]
        for i in range(0, nl, 2):
            we, be = bp["conv_w"][i], bp["conv_b"][i]
            wc, bc = bp["conv_w"][i + 1], bp["conv_b"][i + 1]
            wct = conv_transpose_as_conv(wc)
            for _ in range(S):
                x = x + dts[i] * resc_c[i // 2] * lrelu(conv(x, we, be))
                x = x - dts[i + 1] * conv(lrelu(conv(x, wc, bc)), wct)
        x = lax.reduce_window(x, -jnp.inf, lax.max,
                              (1, 1, 2, 2), (1, 1, 2, 2), "VALID")
    xf = x.reshape(x.shape[0], -1)
    return jnp.dot(xf, params["fc_w"], precision=hp) + params["fc_b"]


# ----------------------------------------------------------------------------
if __name__ == "__main__":
    key = jax.random.PRNGKey(0)
    k_params, k_x = jax.random.split(key)

    in_chan, nf1, nf2, nf3 = 3, 8, 8, 8
    n_l1 = n_l2 = n_l3 = 2
    S, a = 1, 0.5

    params = init_network(k_params, in_chan, (nf1, nf2, nf3), (n_l1, n_l2, n_l3), a)

    # The module hardcodes dim=32, so the spatial size must be 32x32.
    N = 2
    x = jax.random.normal(k_x, (N, in_chan, 32, 32), jnp.float32)

    metas = [dict(H=32, W=32, Cin=in_chan, nf=nf1, nl=n_l1),
             dict(H=16, W=16, Cin=nf1, nf=nf2, nl=n_l2),
             dict(H=8, W=8, Cin=nf2, nf=nf3, nl=n_l3)]

    # Keep >=2 grid steps so v7x's two TensorCores both get work; pack the
    # rest of the batch into the sublane dim of each step (fills MXU rows).
    G = 2 if (N >= 2 and N % 2 == 0) else 1
    B_img = N // G

    prepped = prepare_network(params, metas, S, B_img)
    roll_matches_jnp = detect_roll_convention()

    fwd = jax.jit(lambda xx: network_forward_pallas(
        xx, prepped, metas, S, a, B_img, roll_matches_jnp))
    out = jax.block_until_ready(fwd(x))

    ref = jax.block_until_ready(
        jax.jit(lambda xx: reference_forward(xx, params, a, S))(x))

    assert out.shape == (N, 10), out.shape
    assert out.dtype == jnp.float32
    assert bool(jnp.all(jnp.isfinite(out)))
    assert bool(jnp.allclose(out, ref, rtol=5e-2, atol=5e-2)), (out, ref)
    print("KERNEL_OK")
</pallas_src>

<mosaic_0001>
module attributes {stable_mosaic.version = 11 : i64} {
  func.func @k(%arg0: memref<8x128xf32, #tpu.memory_space<vmem>>, %arg1: memref<8x128xf32, #tpu.memory_space<vmem>>) attributes {dimension_semantics = [], scalar_prefetch = 0 : i64, scratch_operands = 0 : i64, tpu.core_type = #tpu.core_type<tc>} {
    %c0 = arith.constant 0 : index
    %c0_0 = arith.constant 0 : index
    %0 = vector.load %arg0[%c0, %c0_0] : memref<8x128xf32, #tpu.memory_space<vmem>>, vector<8x128xf32>
    %c1_i32 = arith.constant 1 : i32
    %1 = tpu.dynamic_rotate %0 by %c1_i32 dim 0 : vector<8x128xf32>, i32 -> vector<8x128xf32>
    %c0_1 = arith.constant 0 : index
    %c0_2 = arith.constant 0 : index
    %2 = vector.load %arg1[%c0_1, %c0_2] : memref<8x128xf32, #tpu.memory_space<vmem>>, vector<8x128xf32>
    tpu.vector_store %arg1[%c0_1, %c0_2], %1 {strides = array<i32>} : memref<8x128xf32, #tpu.memory_space<vmem>>, vector<8x128xf32>,
    return
  }
}

</mosaic_0001>

<bundles_post_ra>
// kernel: tpu_custom_call.1
= control target key start
LH: loop header
LB: loop body
LE: loop exit
PB: predicated region body
PF: predicated region fallthrough
CT: control target
= control target key end

     0   :  { %6 = vsyncpa [#allocation3], 0  ;;  %s103_s0 = inlined_call_operand.hbm [shape: f32[8,128], index: 0, kind: input, shape index: {}]   ;;  %s104_s1 = inlined_call_operand.hbm [shape: f32[8,128], index: 1, kind: output, shape index: {}]  }
   0x1   :  { %7 = vsyncpa [#allocation4], 0  ;;  %s85_s6 = smov [#allocation2]  }
   0x2   :  { %s14_s7 = sshll.u32 %s85_s6, 4  ;;  %s15_s7 = int_to_ptr.vmem [resolvable:$true] %s14_s7 }
   0x3   :  { %s49_s8 = scalar_lea.vmem %s15_s7, 128  ;;  %p54_p1 = scmp.lt.s32.totalorder %s15_s7, %s15_s7 }
   0x4   :  { %p50_p0 = scmp.ne.s32.totalorder %s15_s7, %s49_s8  ;;  %p55_p2 = scmp.lt.s32.totalorder %s49_s8, %s49_s8 }
   0x6   :  { %p56_p3 = por %p55_p2, %p54_p1 }
   0x8   :  { %p57_p4 = pnand %p56_p3, %p50_p0 }
   0xa   :  { %60 = shalt.err (!%p57_p4)
}
   0xb   :  { %17 = dma.hbm_to_vmem [thread:$0]  %s103_s0, 128, %s15_s7, [#allocation3]  }
   0xc   :  { %81 = dma.done.wait [#allocation3], 128  }
   0xd   :  { %82 = vsyncadd [#allocation3], 4294967168  ;;  %s86_s11 = smov [#allocation5]   ;;  %v21_v0 = vld [vmem:[#allocation2] sm:$0xff] }
   0xe   :  { %s30_s12 = sshll.u32 %s86_s11, 4  ;;  %v22_v1 = vrot.slane %v21_v0, 7  ;;  %s31_s12 = int_to_ptr.vmem [resolvable:$true] %s30_s12 }
   0xf   :  { %s61_s13 = scalar_lea.vmem %s31_s12, 128  ;;  %p66_p6 = scmp.lt.s32.totalorder %s31_s12, %s31_s12 }
  0x10   :  { %23 = vst [vmem:[#allocation5] sm:$0xff] %v22_v1  ;;  %p62_p5 = scmp.ne.s32.totalorder %s31_s12, %s61_s13  ;;  %p67_p7 = scmp.lt.s32.totalorder %s61_s13, %s61_s13 }
  0x12   :  { %p68_p8 = por %p67_p7, %p66_p6 }
  0x14   :  { %p69_p9 = pnand %p68_p8, %p62_p5 }
  0x16   :  { %72 = shalt.err (!%p69_p9)
}
  0x17   :  { %33 = dma.vmem_to_hbm [thread:$0]  %s31_s12, 128, %s104_s1, [#allocation4]  }
  0x18   :  { %83 = dma.done.wait [#allocation4], 128  }
  0x19   :  { %84 = vsyncadd [#allocation4], 4294967168 }
  0x1a   :  { %37 = vsyncpa [#allocation3], 1 }
  0x1b   :  { %38 = vsyncpa [#allocation4], 1 }

</bundles_post_ra>
